<compile_context>
chip_gen: v6e
topology: v6e:2x2x1
jax: 0.10.0
libtpu: 0.0.40
codegen_flags: <defaults>
</compile_context>

<pallas_src>
import functools

import jax
import jax.numpy as jnp
from jax.experimental import pallas as pl
from jax.experimental.pallas import tpu as pltpu


def _gumbel_sampling_kernel(x_ref, g_ref, w_ref, samp_ref, attn_ref, *, tau, hard, block_b):
    # weight is shared by every batch element in the block; cast once for the MXU.
    w = w_ref[...].astype(jnp.bfloat16)            # (S, D)
    inv_tau = 1.0 / tau

    for b in range(block_b):                       # static unroll; block_b is small (<= 8)
        xb = x_ref[b]                              # (N, D) native layout, no transpose
        xb_bf = xb.astype(jnp.bfloat16)

        # logits^T = W @ x_b^T : (S, N), contracting D of both operands (trans_b on MXU).
        logits_t = jax.lax.dot_general(
            w, xb_bf, (((1,), (1,)), ((), ())),
            preferred_element_type=jnp.float32)

        # NOTE: the nn.Linear bias is constant along the softmax axis (N) for every
        # (batch, s) row, so it cancels exactly in gumbel_softmax -> omitted.
        y = (logits_t + g_ref[b]) * inv_tau        # gumbel noise g: (S, N), f32
        y = y - jnp.max(y, axis=-1, keepdims=True)
        e = jnp.exp(y)
        attn = e * pl.reciprocal(jnp.sum(e, axis=-1, keepdims=True), approx=True)

        if hard:
            # Forward-value hard one-hot, first-index tie-break (matches jnp.argmax).
            # argmax is invariant to the per-row positive normalization factor, so the
            # approx reciprocal does not change the selected index.
            # TODO(synk): no straight-through gradient (y_hard - sg(y_soft) + y_soft);
            # forward pass only.
            n = attn.shape[-1]
            iota = jax.lax.broadcasted_iota(jnp.int32, attn.shape, 1)
            m = jnp.max(attn, axis=-1, keepdims=True)
            idx = jnp.min(jnp.where(attn == m, iota, n), axis=-1, keepdims=True)
            attn = jnp.where(iota == idx, 1.0, 0.0).astype(attn.dtype)

        # sampled = attn @ x_b : (S, D)  -- lane-dense store over D.
        sampled = jnp.dot(attn.astype(jnp.bfloat16), xb_bf,
                          preferred_element_type=jnp.float32)

        attn_ref[b] = attn.astype(attn_ref.dtype)
        samp_ref[b] = sampled.astype(samp_ref.dtype)


def _pick_block_b(B, N, D, S, *, vmem_budget_bytes=24 << 20, max_block_b=8):
    """Largest divisor of B (<= max_block_b) whose double-buffered blocks fit the VMEM
    budget, while keeping >= 2 grid steps when B >= 2 (v7x has 2 TensorCores)."""
    best = 1
    for tb in range(1, min(B, max_block_b) + 1):
        if B % tb:
            continue
        # double-buffered in blocks (x, g) + out blocks (sampled, attn) + resident weight
        per_step = 2 * tb * (N * D + 2 * S * N + S * D) * 4 + S * D * 4
        if per_step > vmem_budget_bytes:
            continue
        if B // tb >= min(2, B):
            best = tb
    return best


def gumbel_sampling(x, weight, bias, gumbel_noise, tau=1.0, hard=False):
    """x: (B, N, D), weight: (S, D), bias: (S,), gumbel_noise: (B, S, N).

    Returns (sampled.transpose(1, 2): (B, D, S), attn: (B, S, N)), matching PyTorch.
    `bias` is accepted for API fidelity but is mathematically a no-op for the forward
    outputs (constant shift along the softmax axis), so it is not passed to the kernel."""
    del bias
    B, N, D = x.shape
    S = weight.shape[0]
    block_b = _pick_block_b(B, N, D, S)

    kernel = functools.partial(
        _gumbel_sampling_kernel, tau=float(tau), hard=bool(hard), block_b=block_b)

    sampled, attn = pl.pallas_call(
        kernel,
        out_shape=(
            jax.ShapeDtypeStruct((B, S, D), x.dtype),   # lane-dense over D
            jax.ShapeDtypeStruct((B, S, N), x.dtype),
        ),
        grid=(B // block_b,),
        in_specs=[
            pl.BlockSpec((block_b, N, D), lambda i: (i, 0, 0)),   # x, native layout
            pl.BlockSpec((block_b, S, N), lambda i: (i, 0, 0)),   # gumbel noise
            pl.BlockSpec((S, D), lambda i: (0, 0)),               # weight, grid-invariant
        ],
        out_specs=(
            pl.BlockSpec((block_b, S, D), lambda i: (i, 0, 0)),
            pl.BlockSpec((block_b, S, N), lambda i: (i, 0, 0)),
        ),
        compiler_params=pltpu.CompilerParams(
            dimension_semantics=("parallel",),
            vmem_limit_bytes=48 << 20,   # leaves headroom on v7x's 64 MiB physical VMEM
        ),
    )(x, gumbel_noise, weight)

    # Cheap layout-only transpose on the small (B, S, D) tensor (S << N typically).
    return jnp.transpose(sampled, (0, 2, 1)), attn


def _reference(x, weight, bias, gumbel_noise, tau=1.0, hard=False):
    logits = jnp.einsum("bnd,sd->bns", x, weight) + bias            # (B, N, S)
    y = (jnp.transpose(logits, (0, 2, 1)) + gumbel_noise) / tau     # (B, S, N)
    attn = jax.nn.softmax(y, axis=-1)
    if hard:
        attn = jax.nn.one_hot(jnp.argmax(attn, axis=-1), attn.shape[-1], dtype=attn.dtype)
    sampled = jnp.einsum("bsn,bnd->bsd", attn, x)
    return jnp.transpose(sampled, (0, 2, 1)), attn


if __name__ == "__main__":
    key = jax.random.PRNGKey(0)
    B, N, D, S = 2, 16, 32, 8          # batch, num_points, in_features, sampling_n
    kx, kw, kb, kg = jax.random.split(key, 4)

    x = jax.random.normal(kx, (B, N, D), dtype=jnp.float32)
    weight = jax.random.normal(kw, (S, D), dtype=jnp.float32) * (1.0 / jnp.sqrt(D))
    bias = jax.random.normal(kb, (S,), dtype=jnp.float32) * 0.01
    # TODO(synk): torch.gumbel_softmax draws noise internally with torch RNG; here the
    # Gumbel(0,1) noise is drawn deterministically with jax.random and fed to the kernel.
    gumbel_noise = jax.random.gumbel(kg, (B, S, N), dtype=jnp.float32)

    sampled_t, attn = gumbel_sampling(x, weight, bias, gumbel_noise, tau=1.0, hard=False)
    jax.block_until_ready((sampled_t, attn))

    ref_s, ref_a = _reference(x, weight, bias, gumbel_noise, tau=1.0, hard=False)
    assert sampled_t.shape == (B, D, S) and attn.shape == (B, S, N)
    # Tolerances account for bf16 MXU operands + approx reciprocal (f32 accumulation).
    assert jnp.allclose(attn, ref_a, atol=3e-2, rtol=3e-2), \
        float(jnp.max(jnp.abs(attn - ref_a)))
    assert jnp.allclose(sampled_t, ref_s, atol=8e-2, rtol=5e-2), \
        float(jnp.max(jnp.abs(sampled_t - ref_s)))

    # hard=True forward path: every (b, s) row must be an exact one-hot.
    hard_s, hard_a = gumbel_sampling(x, weight, bias, gumbel_noise, tau=1.0, hard=True)
    jax.block_until_ready((hard_s, hard_a))
    assert jnp.allclose(jnp.sum(hard_a, axis=-1), 1.0)
    assert jnp.allclose(jnp.max(hard_a, axis=-1), 1.0)

    print("KERNEL_OK")
</pallas_src>

<mosaic_0001>
module attributes {stable_mosaic.version = 11 : i64} {
  func.func @_gumbel_sampling_kernel(%arg0: i32, %arg1: memref<1x16x32xf32, #tpu.memory_space<vmem>>, %arg2: memref<1x8x16xf32, #tpu.memory_space<vmem>>, %arg3: memref<8x32xf32, #tpu.memory_space<vmem>>, %arg4: memref<1x8x32xf32, #tpu.memory_space<vmem>>, %arg5: memref<1x8x16xf32, #tpu.memory_space<vmem>>) attributes {dimension_semantics = [#tpu.dimension_semantics<parallel>], iteration_bounds = array<i64: 2>, scalar_prefetch = 0 : i64, scratch_operands = 0 : i64, tpu.core_type = #tpu.core_type<tc>, window_params = [{transform_indices = @transform_0, window_bounds = array<i64: 1, 16, 32>}, {transform_indices = @transform_1, window_bounds = array<i64: 1, 8, 16>}, {pipeline_mode = #tpu.pipeline_mode<synchronous>, transform_indices = @transform_2, window_bounds = array<i64: 8, 32>}, {transform_indices = @transform_3, window_bounds = array<i64: 1, 8, 32>}, {transform_indices = @transform_4, window_bounds = array<i64: 1, 8, 16>}]} {
    %c0 = arith.constant 0 : index
    %c0_0 = arith.constant 0 : index
    %0 = vector.load %arg3[%c0, %c0_0] : memref<8x32xf32, #tpu.memory_space<vmem>>, vector<8x32xf32>
    %1 = arith.truncf %0 : vector<8x32xf32> to vector<8x32xbf16>
    %c0_1 = arith.constant 0 : index
    %c0_2 = arith.constant 0 : index
    %c0_3 = arith.constant 0 : index
    %2 = vector.load %arg1[%c0_1, %c0_2, %c0_3] : memref<1x16x32xf32, #tpu.memory_space<vmem>>, vector<1x16x32xf32>
    %3 = vector.shape_cast %2 : vector<1x16x32xf32> to vector<16x32xf32>
    %4 = arith.truncf %3 : vector<16x32xf32> to vector<16x32xbf16>
    %cst = arith.constant dense<0.000000e+00> : vector<8x16xf32>
    %5 = tpu.matmul %1, %4, %cst {dimension_numbers = #tpu.dot_dimension_numbers<[1], [1], [0], [0], [0, 0, 1, 0], [], []>} : vector<8x32xbf16>, vector<16x32xbf16>, vector<8x16xf32> -> vector<8x16xf32>
    %c0_4 = arith.constant 0 : index
    %c0_5 = arith.constant 0 : index
    %c0_6 = arith.constant 0 : index
    %6 = vector.load %arg2[%c0_4, %c0_5, %c0_6] : memref<1x8x16xf32, #tpu.memory_space<vmem>>, vector<1x8x16xf32>
    %7 = vector.shape_cast %6 : vector<1x8x16xf32> to vector<8x16xf32>
    %8 = arith.addf %5, %7 : vector<8x16xf32>
    %cst_7 = arith.constant 1.000000e+00 : f32
    %9 = vector.broadcast %cst_7 : f32 to vector<8x16xf32>
    %10 = arith.mulf %8, %9 : vector<8x16xf32>
    %cst_8 = arith.constant dense<0xFF800000> : vector<8xf32>
    %11 = vector.multi_reduction <maximumf>, %10, %cst_8 [1] : vector<8x16xf32> to vector<8xf32>
    %12 = vector.shape_cast %11 : vector<8xf32> to vector<8x1xf32>
    %13 = vector.broadcast %12 : vector<8x1xf32> to vector<8x16xf32>
    %14 = arith.subf %10, %13 : vector<8x16xf32>
    %15 = math.exp %14 : vector<8x16xf32>
    %cst_9 = arith.constant dense<0.000000e+00> : vector<8xf32>
    %16 = vector.multi_reduction <add>, %15, %cst_9 [1] : vector<8x16xf32> to vector<8xf32>
    %17 = vector.shape_cast %16 : vector<8xf32> to vector<8x1xf32>
    %18 = tpu.reciprocal %17 {approx = true} : vector<8x1xf32> -> vector<8x1xf32>
    %19 = vector.broadcast %18 : vector<8x1xf32> to vector<8x16xf32>
    %20 = arith.mulf %15, %19 : vector<8x16xf32>
    %21 = arith.truncf %20 : vector<8x16xf32> to vector<8x16xbf16>
    %cst_10 = arith.constant dense<0.000000e+00> : vector<8x32xf32>
    %22 = tpu.matmul %21, %4, %cst_10 {dimension_numbers = #tpu.dot_dimension_numbers<[1], [0], [0], [1], [0, 0, 1, 1], [], []>} : vector<8x16xbf16>, vector<16x32xbf16>, vector<8x32xf32> -> vector<8x32xf32>
    %c0_11 = arith.constant 0 : index
    %c0_12 = arith.constant 0 : index
    %c0_13 = arith.constant 0 : index
    %23 = vector.load %arg5[%c0_11, %c0_12, %c0_13] : memref<1x8x16xf32, #tpu.memory_space<vmem>>, vector<1x8x16xf32>
    %24 = vector.shape_cast %23 : vector<1x8x16xf32> to vector<8x16xf32>
    %25 = vector.shape_cast %20 : vector<8x16xf32> to vector<1x8x16xf32>
    tpu.vector_store %arg5[%c0_11, %c0_12, %c0_13], %25 {strides = array<i32>} : memref<1x8x16xf32, #tpu.memory_space<vmem>>, vector<1x8x16xf32>,
    %c0_14 = arith.constant 0 : index
    %c0_15 = arith.constant 0 : index
    %c0_16 = arith.constant 0 : index
    %26 = vector.load %arg4[%c0_14, %c0_15, %c0_16] : memref<1x8x32xf32, #tpu.memory_space<vmem>>, vector<1x8x32xf32>
    %27 = vector.shape_cast %26 : vector<1x8x32xf32> to vector<8x32xf32>
    %28 = vector.shape_cast %22 : vector<8x32xf32> to vector<1x8x32xf32>
    tpu.vector_store %arg4[%c0_14, %c0_15, %c0_16], %28 {strides = array<i32>} : memref<1x8x32xf32, #tpu.memory_space<vmem>>, vector<1x8x32xf32>,
    return
  }
  func.func @transform_0(%arg0: i32) -> (i32, i32, i32) {
    %c0_i32 = arith.constant 0 : i32
    %c0_i32_0 = arith.constant 0 : i32
    %c0_i32_1 = arith.constant 0 : i32
    return %arg0, %c0_i32, %c0_i32_0 : i32, i32, i32
  }
  func.func @transform_1(%arg0: i32) -> (i32, i32, i32) {
    %c0_i32 = arith.constant 0 : i32
    %c0_i32_0 = arith.constant 0 : i32
    %c0_i32_1 = arith.constant 0 : i32
    return %arg0, %c0_i32, %c0_i32_0 : i32, i32, i32
  }
  func.func @transform_2(%arg0: i32) -> (i32, i32) {
    %c0_i32 = arith.constant 0 : i32
    %c0_i32_0 = arith.constant 0 : i32
    %c0_i32_1 = arith.constant 0 : i32
    return %c0_i32, %c0_i32_0 : i32, i32
  }
  func.func @transform_3(%arg0: i32) -> (i32, i32, i32) {
    %c0_i32 = arith.constant 0 : i32
    %c0_i32_0 = arith.constant 0 : i32
    %c0_i32_1 = arith.constant 0 : i32
    return %arg0, %c0_i32, %c0_i32_0 : i32, i32, i32
  }
  func.func @transform_4(%arg0: i32) -> (i32, i32, i32) {
    %c0_i32 = arith.constant 0 : i32
    %c0_i32_0 = arith.constant 0 : i32
    %c0_i32_1 = arith.constant 0 : i32
    return %arg0, %c0_i32, %c0_i32_0 : i32, i32, i32
  }
}

</mosaic_0001>

<bundles_post_ra>
// kernel: tpu_custom_call.1
= control target key start
LH: loop header
LB: loop body
LE: loop exit
PB: predicated region body
PF: predicated region fallthrough
CT: control target
= control target key end

     0   :  { %s1135_s0 = inlined_call_operand.hbm [shape: f32[2,16,32], index: 0, kind: input, shape index: {}]   ;;  %s1136_s1 = inlined_call_operand.hbm [shape: f32[2,8,16], index: 1, kind: input, shape index: {}]   ;;  %s1137_s2 = inlined_call_operand.hbm [shape: f32[8,32], index: 2, kind: input, shape index: {}]   ;;  %s1138_s3 = inlined_call_operand.hbm [shape: f32[2,8,32], index: 3, kind: output, shape index: {0}]   ;;  %s1139_s4 = inlined_call_operand.hbm [shape: f32[2,8,16], index: 4, kind: output, shape index: {1}]  }
   0x1   :  { %1145 = sst [smem:[#allocation18_spill]] %s1135_s0 }
   0x2   :  { %1146 = sst [smem:[#allocation19_spill]] %s1137_s2 }
   0x3   :  { %10 = vsyncpa [#allocation3], 0 }
   0x4   :  { %12 = vsyncpa [#allocation3 + $0x1], 0 }
   0x5   :  { %13 = vsyncpa [#allocation6], 0 }
   0x6   :  { %15 = vsyncpa [#allocation6 + $0x1], 0 }
   0x7   :  { %16 = vsyncpa [#allocation4], 0 }
   0x8   :  { %18 = vsyncpa [#allocation4 + $0x1], 0 }
   0x9   :  { %19 = vsyncpa [#allocation10], 0 }
   0xa   :  { %21 = vsyncpa [#allocation10 + $0x1], 0  ;;  %s889_s15 = smov 0   ;;  %s891_s16 = smov 0  }
   0xb   :  { %s893_s17 = smov 0   ;;  %s895_s18 = smov 0  }
   0xc LB: > { %1147 = sst [smem:[#allocation16_spill]] %s849_s17  ;;  %s910_s19 = sadd.s32 4294967295, %s853_s18   ;;  %s853_s18 = sphi %s895_s18, %s1170_s18   ;;  %s849_s17 = sphi %s893_s17, %s1167_s17   ;;  %s845_s16 = sphi %s891_s16, %s1169_s16   ;;  %s841_s15 = sphi %s889_s15, %s1168_s15  }
   0xd   : > { %s554_s20 = sadd.s32 4294967294, %s853_s18   ;;  %s914_s21 = sadd.s32 1, %s853_s18  }
   0xe   : > { %s34_s22 = sadd.s32 1, %s849_s17  ;;  %s31_s23 = ssub.s32 %s853_s18, %s914_s21 }
   0xf   : > { %p41_p0 = scmp.ne.s32.totalorder %s849_s17, %s845_s16  ;;  %p32_p1 = scmp.eq.s32.totalorder %s31_s23, 0 }
  0x10   : > { %p42_p2 = scmp.eq.s32.totalorder %s853_s18, 0  ;;  %p47_p3 = scmp.ne.s32.totalorder %s845_s16, %s841_s15 }
  0x11   : > { %p1140_p4 = scmp.eq.s32.totalorder %s910_s19, 0  ;;  %p118_p7 = scmp.eq.s32.totalorder %s910_s19, 1 }
  0x12   : > { %s926_s24 = scalar_select %p32_p1, %s849_s17, %s34_s22  }
  0x13   : > { %p928_p5 = por %p42_p2, %p41_p0  ;;  %p934_p6 = por %p1140_p4, %p47_p3 }
  0x14   : > { %1148 = sst [smem:[#allocation17_spill]] %s926_s24  ;;  %p124_p8 = scmp.eq.s32.totalorder %s554_s20, 1 }
  0x15   : > { %s1150_s26 = scalar_select %p934_p6, 1, 0 }
  0x16   : > { %p555_p9 = scmp.ge.s32.totalorder %s853_s18, 1  ;;  %p157_p10 = scmp.lt.s32.totalorder %s853_s18, 3 }
  0x17   : > { %p941_p11 = por %p118_p7, %p41_p0  ;;  %p945_p12 = por %p124_p8, %p47_p3 }
  0x18   : > { %p949_p13 = pnand %p555_p9, %p157_p10  ;;  %s855_s30 = smov [#allocation7]  }
  0x19   : > { %s1151_s27 = scalar_select %p941_p11, 1, 0 }
  0x1a   : > { %s1152_s28 = scalar_select %p945_p12, 1, 0 }
  0x1b   : > { %s1153_s29 = scalar_select %p949_p13, 1, 0 }
  0x1c   : > { %p606_p2 = pneg %p949_p13  ;;  %s170_s5 = sshll.u32 %s855_s30, 4  ;;  %s171_s5 = int_to_ptr.vmem [resolvable:$true] %s170_s5 }
  0x1d   : > { %p625_p4 = scmp.lt.s32.totalorder %s853_s18, 2  ;;  %p1154_p0 = scmp.eq.s32.totalorder %s910_s19, 0 }
  0x1e   : > { %s964_s7 = sand.u32 1, %s849_s17   ;;  %s680_s10 = scalar_lea.vmem %s171_s5, 128 }
  0x1f   : > { %p959_p7 = pnand %p606_p2, %p1154_p0  ;;  %p968_p3 = pnand %p625_p4, %p928_p5 }
  0x20   : > { %s558_s9 = sshll.u32 %s964_s7, 4  ;;  %p681_p9 = scmp.ne.s32.totalorder %s171_s5, %s680_s10 }
  0x21   : > { %p671_p8 = pneg %p959_p7  ;;  %p688_p2 = scmp.lt.s32.totalorder %s171_s5, %s171_s5 }
  0x22   : > { %p689_p0 = scmp.lt.s32.totalorder %s680_s10, %s680_s10 }
  0x23   : > { %p683_p10 = pnand %p681_p9, %p671_p8 }
  0x24   : > { %p690_p12 = por %p689_p0, %p688_p2 }
  0x25   : > { %p684_p1 = pneg %p683_p10 }
  0x27   : > { %p691_p11 = pnand %p690_p12, %p684_p1 }
  0x29   : > { %694 = shalt.err (!%p691_p11)
}
  0x2a   : > { %s1157_s2 = sld [smem:[#allocation19_spill]]  ;;  %s577_s13 = sshll.u32 %s853_s18, 8 }
  0x2b   : > { %s185_s14 = scalar_lea.vmem [#allocation2], %s558_s9  ;;  %s1158_s0 = sld [smem:[#allocation18_spill]] }
  0x2c   : > { %s192_s20 = sshll.u32 %s185_s14, 4  ;;  %s182_s30 = scalar_lea.sflag [#allocation3], %s964_s7  ;;  %s986_s20 = int_to_ptr.vmem [resolvable:$true] %s192_s20 }
  0x2d   : > { %p697_p5 = pneg %p968_p3 }
  0x30   : > { %609 = dma.hbm_to_vmem [thread:$0]  (!%p959_p7), %s1157_s2, 128, %s171_s5, [#allocation6]  }
  0x31   : > { %s984_s25 = scalar_lea.hbm %s1158_s0, %s577_s13  ;;  %s700_s10 = scalar_lea.hbm %s1158_s0, 512 }
  0x32   : > { %s695_s6 = scalar_lea.hbm %s984_s25, 256  ;;  %p701_p1 = scmp.lt.s32.totalorder %s984_s25, %s1158_s0 }
  0x33   : > { %p696_p4 = scmp.ne.s32.totalorder %s984_s25, %s695_s6  ;;  %p702_p7 = scmp.lt.s32.totalorder %s700_s10, %s695_s6 }
  0x35   : > { %p698_p11 = pnand %p697_p5, %p696_p4  ;;  %p703_p8 = por %p702_p7, %p701_p1 }
  0x37   : > { %p699_p12 = pneg %p698_p11 }
  0x39   : > { %p704_p9 = pnand %p703_p8, %p699_p12 }
  0x3b   : > { %707 = shalt.err (!%p704_p9)
}
  0x3c   : > { %s708_s13 = scalar_lea.vmem %s986_s20, 256  ;;  %s856_s14 = smov [#allocation2]  }
  0x3d   : > { %p709_p10 = scmp.ne.s32.totalorder %s986_s20, %s708_s13  ;;  %s713_s22 = sshll.u32 %s856_s14, 4  ;;  %s714_s22 = int_to_ptr.vmem [resolvable:$false] %s713_s22 }
  0x3e   : > { %s715_s23 = scalar_lea.vmem %s714_s22, 512  ;;  %p716_p4 = scmp.lt.s32.totalorder %s986_s20, %s714_s22 }
  0x3f   : > { %p711_p2 = pnand %p709_p10, %p697_p5  ;;  %p717_p11 = scmp.lt.s32.totalorder %s715_s23, %s708_s13 }
  0x41   : > { %p712_p0 = pneg %p711_p2  ;;  %p718_p6 = por %p717_p11, %p716_p4 }
  0x43   : > { %p719_p1 = pnand %p718_p6, %p712_p0 }
  0x45   : > { %722 = shalt.err (!%p719_p1)
}
  0x46   : > { %s857_s6 = smov 128   ;;  %s858_s5 = smov 8  }
  0x47   : > { %613 = dma.hbm_to_vmem [thread:$0]  (!%p968_p3), %s984_s25, 256, %s986_s20, %s182_s30, %s857_s6, %s857_s6, %s858_s5  }
  0x48   : > { %s202_s9 = sand.u32 1, %s853_s18   ;;  %s561_s10 = sshll.u32 %s964_s7, 3 }
  0x49   : > { %s562_s11 = sshll.u32 %s853_s18, 7  ;;  %s206_s12 = scalar_lea.vmem [#allocation5], %s561_s10 }
  0x4a   : > { %s213_s13 = sshll.u32 %s206_s12, 4  ;;  %s211_s23 = scalar_lea.hbm %s1136_s1, %s562_s11  ;;  %s214_s13 = int_to_ptr.vmem [resolvable:$true] %s213_s13 }
  0x4b   : > { %s203_s0 = scalar_lea.sflag [#allocation6], %s202_s9  ;;  %s723_s2 = scalar_lea.hbm %s211_s23, 128 }
  0x4c   : > { %p724_p6 = scmp.ne.s32.totalorder %s211_s23, %s723_s2  ;;  %s728_s20 = scalar_lea.hbm %s1136_s1, 256 }
  0x4d   : > { %p729_p8 = scmp.lt.s32.totalorder %s211_s23, %s1136_s1  ;;  %p730_p9 = scmp.lt.s32.totalorder %s728_s20, %s723_s2 }
  0x4e   : > { %p726_p12 = pnand %p724_p6, %p697_p5 }
  0x4f   : > { %p731_p10 = por %p730_p9, %p729_p8 }
  0x50   : > { %p727_p7 = pneg %p726_p12 }
  0x52   : > { %p732_p2 = pnand %p731_p10, %p727_p7 }
  0x54   : > { %735 = shalt.err (!%p732_p2)
}
  0x55   : > { %s736_s30 = scalar_lea.vmem %s214_s13, 128  ;;  %s859_s6 = smov [#allocation5]  }
  0x56   : > { %p737_p0 = scmp.ne.s32.totalorder %s214_s13, %s736_s30  ;;  %s741_s5 = sshll.u32 %s859_s6, 4  ;;  %s742_s5 = int_to_ptr.vmem [resolvable:$false] %s741_s5 }
  0x57   : > { %s743_s17 = scalar_lea.vmem %s742_s5, 256  ;;  %p744_p1 = scmp.lt.s32.totalorder %s214_s13, %s742_s5 }
  0x58   : > { %p739_p4 = pnand %p737_p0, %p697_p5  ;;  %p745_p6 = scmp.lt.s32.totalorder %s743_s17, %s736_s30 }
  0x5a   : > { %p740_p11 = pneg %p739_p4  ;;  %p746_p12 = por %p745_p6, %p744_p1 }
  0x5c   : > { %p747_p13 = pnand %p746_p12, %p740_p11 }
  0x5e   : > { %750 = shalt.err (!%p747_p13)
}
  0x5f   : > { %616 = dma.hbm_to_vmem [thread:$0]  (!%p968_p3), %s211_s23, 128, %s214_s13, %s203_s0  }
  0x60   : > { %p1159_p7 = scmp.ne.s32.totalorder %s1153_s29, 0 }
  0x61   : > { %s1038_s2 = sand.u32 (!%p1159_p7), 1, %s845_s16   ;;  %p1160_p5 = scmp.ne.s32.totalorder (!%p1159_p7), %s1150_s26, 0 }
  0x62   : > { %222 = sbr.rel (%p1159_p7) target bundleno = 839 (0x347), region = 32  ;;  %s564_s24 = sshll.u32 (!%p1159_p7), %s1038_s2, 4 }
  0x63   : > { %s225_s9 = scalar_lea.sflag (!%p1159_p7), [#allocation3], %s1038_s2  ;;  %s228_s10 = scalar_lea.vmem (!%p1159_p7), [#allocation2], %s564_s24 }
  0x67   : > { %820 = dma.done.wait (%p1160_p5), %s225_s9, 256  }
  0x68   : > { %822 = vsyncadd (%p1160_p5), %s225_s9, 4294967040  ;;  %s233_s0 = sand.u32 1, %s910_s19   ;;  %s1048_s29 = sshll.u32 %s1038_s2, 3 }
  0x69   : > { %s234_s8 = scalar_lea.sflag [#allocation6], %s233_s0  ;;  %s237_s11 = scalar_lea.vmem [#allocation5], %s1048_s29 }
  0x6a   : > { %824 = dma.done.wait (%p1160_p5), %s234_s8, 128  }
  0x6b   : > { %826 = vsyncadd (%p1160_p5), %s234_s8, 4294967168  ;;  %p1161_p13 = scmp.eq.s32.totalorder %s910_s19, 0 }
  0x6d   : > { %828 = dma.done.wait (%p1161_p13), [#allocation6], 128   ;;  %p1162_p3 = pmov %p1161_p13 }
  0x6e   : > { %v860_v0 = vmov 0.0   ;;  %vm861_vm0 = vmmov 0   ;;  %v279_v1 = vld [vmem:[%s228_s10] sm:$0xff]  ;;  %v280_v2 = vld [vmem:[%s228_s10 + $0x8] sm:$0xff]  ;;  %vm283_vm1 = vcmask 261120   ;;  %vm330_vm2 = vcmask 130048  }
  0x6f   : > { %830 = vsyncadd (%p1162_p3), [#allocation6], 4294967168  ;;  %582 = vmatprep.subr.bf16.mxu0 %v860_v0  ;;  %584 = vmatprep.mubr.msk.bf16.mxu0 %vm861_vm0, %v860_v0  ;;  %v281_v3 = vpack.c.bf16 %v280_v2, %v279_v1  ;;  %v277_v5 = vld [vmem:[#allocation7] sm:$0xff]  ;;  %v282_v7 = vld [vmem:[%s237_s11] sm:$0xff]  ;;  %s275_s26 = scalar_lea.vmem [#allocation9], %s1048_s29  ;;  %s573_s12 = sshll.u32 %s910_s19, 7 }
  0x70   : > { %588 = vmatprep.subr.bf16.mxu1 %v860_v0  ;;  %590 = vmatprep.mubr.msk.bf16.mxu1 %vm861_vm0, %v860_v0  ;;  %v278_v6 = vpack.c.bf16 %v277_v5, %v277_v5  ;;  %s418_s22 = scalar_lea.hbm %s1139_s4, %s573_s12  ;;  %s420_s23 = sshll.u32 %s275_s26, 4  ;;  %s421_s23 = int_to_ptr.vmem [resolvable:$true] %s420_s23 }
  0x71   : > { %v288_v4 = vsel %vm283_vm1, %v281_v3, 0  ;;  %589 = vmatpush3.bf16.msra.mxu1 %v281_v3  ;;  %s394_s20 = scalar_lea.sflag [#allocation10], %s1038_s2  ;;  %s751_s7 = scalar_lea.vmem %s421_s23, 128 }
  0x72   : > { %583 = vmatpush3.bf16.xpose.msra.mxu0 %v288_v4  ;;  %p752_p8 = scmp.ne.s32.totalorder %s421_s23, %s751_s7  ;;  %p1163_p9 = scmp.ne.s32.totalorder %s1151_s27, 0 }
  0x73   : > { %s862_s25 = smov [#allocation9]  }
  0x74   : > { %p753_p10 = pnand %p752_p8, %p1163_p9  ;;  %s755_s30 = sshll.u32 %s862_s25, 4  ;;  %s756_s30 = int_to_ptr.vmem [resolvable:$false] %s755_s30 }
  0x75   : > { %s757_s6 = scalar_lea.vmem %s756_s30, 256  ;;  %p758_p0 = scmp.lt.s32.totalorder %s421_s23, %s756_s30 }
  0x76   : > { %p754_p2 = pneg %p753_p10  ;;  %p759_p4 = scmp.lt.s32.totalorder %s757_s6, %s751_s7 }
  0x78   : > { %p760_p11 = por %p759_p4, %p758_p0 }
  0x79   : > { %585 = vmatmul.mubr.msk.bf16.vlgmr.msra.gmra.mxu0 %vm283_vm1, %v278_v6 }
  0x7a   : > { %p761_p1 = pnand %p760_p11, %p754_p2 }
 0x139   : > { %v324_v8 = vpop.f32.mrf.mxu0 }
 0x13a   : > { %v325_v9 = vadd.f32 %v324_v8, %v282_v7 }
 0x13b   : > { %v586_v10 = vpop.f32.mrf.mxu0 }
 0x13c   : > { %v331_v11 = vsel %vm330_vm2, %v325_v9, -inf }
 0x13d   : > { %332 = vmax.xlane.f32.xlu0 %v331_v11  ;;  %v327_v12 = vpop.f32.mrf.mxu0 }
 0x13f   : > { %v587_v13 = vpop.f32.mrf.mxu0 }
 0x1c6   : > { %v333_v14 = vpop.xlane.xlu0 %332 }
 0x1c7   : > { %v334_v15 = vsub.f32 %v325_v9, %v333_v14 }
 0x1c9   : > { %v335_v16 = vmul.f32 1.442695, %v334_v15 }
 0x1cb   : > { %665 = vpow2.f32 %v335_v16 }
 0x1d8   : > { %v666_v17 = vpop.eup %665 }
 0x1d9   : > { %v337_v18 = vsel %vm330_vm2, %v666_v17, 0.0 }
 0x1da   : > { %338 = vadd.xlane.f32.xlu0 %v337_v18 }
 0x263   : > { %v339_v19 = vpop.xlane.xlu0 %338 }
 0x264   : > { %667 = vrcp.f32 %v339_v19 }
 0x271   : > { %v668_v20 = vpop.eup %667 }
 0x272   : > { %v341_v21 = vmul.f32 %v668_v20, %v666_v17 }
 0x274   : > { %v342_v22 = vpack.c.bf16 %v341_v21, %v341_v21  ;;  %386 = vst.msk [vmem:[%s275_s26] sm:$0xff] %vm330_vm2, %v341_v21 }
 0x276   : > { %591 = vmatmul.mubr.msk.bf16.vlgmr.msra.gmra.mxu1 %vm330_vm2, %v342_v22 }
 0x277   : > { %764 = shalt.err (!%p761_p1)
}
 0x278   : > { %s765_s5 = scalar_lea.hbm %s418_s22, 128  ;;  %s769_s9 = scalar_lea.hbm %s1139_s4, 256 }
 0x279   : > { %p766_p6 = scmp.ne.s32.totalorder %s418_s22, %s765_s5  ;;  %p770_p5 = scmp.lt.s32.totalorder %s418_s22, %s1139_s4 }
 0x27a   : > { %p771_p13 = scmp.lt.s32.totalorder %s769_s9, %s765_s5 }
 0x27b   : > { %p767_p12 = pnand %p766_p6, %p1163_p9 }
 0x27c   : > { %p772_p3 = por %p771_p13, %p770_p5 }
 0x27d   : > { %p768_p7 = pneg %p767_p12 }
 0x27f   : > { %p773_p8 = pnand %p772_p3, %p768_p7 }
 0x281   : > { %776 = shalt.err (!%p773_p8)
}
 0x282   : > { %603 = dma.vmem_to_hbm [thread:$0]  (%p1163_p9), %s421_s23, 128, %s418_s22, %s394_s20  }
 0x283   : > { %s268_s8 = scalar_lea.vmem [#allocation8], %s1048_s29  ;;  %s1091_s14 = scalar_lea.hbm %s1138_s3, %s573_s12 }
 0x284   : > { %s407_s11 = sshll.u32 %s268_s8, 4  ;;  %s389_s7 = scalar_lea.sflag [#allocation4], %s1038_s2  ;;  %s1093_s11 = int_to_ptr.vmem [resolvable:$true] %s407_s11 }
 0x285   : > { %s777_s25 = scalar_lea.vmem %s1093_s11, 128  ;;  %s863_s19 = smov [#allocation8]  }
 0x286   : > { %p778_p10 = scmp.ne.s32.totalorder %s1093_s11, %s777_s25  ;;  %s781_s29 = sshll.u32 %s863_s19, 4  ;;  %s782_s29 = int_to_ptr.vmem [resolvable:$false] %s781_s29 }
 0x287   : > { %s783_s12 = scalar_lea.vmem %s782_s29, 256  ;;  %p784_p4 = scmp.lt.s32.totalorder %s1093_s11, %s782_s29 }
 0x288   : > { %p779_p2 = pnand %p778_p10, %p1163_p9  ;;  %p785_p11 = scmp.lt.s32.totalorder %s783_s12, %s777_s25 }
 0x28a   : > { %p780_p0 = pneg %p779_p2  ;;  %p786_p1 = por %p785_p11, %p784_p4 }
 0x28c   : > { %p787_p6 = pnand %p786_p1, %p780_p0 }
 0x336   : > { %v380_v23 = vpop.f32.mrf.mxu1 }
 0x337   : > { %387 = vst.msk [vmem:[%s268_s8] sm:$0xff] %vm283_vm1, %v380_v23 }
 0x338   : > { %v592_v24 = vpop.f32.mrf.mxu1 }
 0x339   : > { %790 = shalt.err (!%p787_p6)
}
 0x33a   : > { %s791_s22 = scalar_lea.hbm %s1091_s14, 128  ;;  %s795_s20 = scalar_lea.hbm %s1138_s3, 256 }
 0x33b   : > { %p792_p12 = scmp.ne.s32.totalorder %s1091_s14, %s791_s22  ;;  %p796_p13 = scmp.lt.s32.totalorder %s1091_s14, %s1138_s3 }
 0x33c   : > { %p797_p3 = scmp.lt.s32.totalorder %s795_s20, %s791_s22 }
 0x33d   : > { %p793_p7 = pnand %p792_p12, %p1163_p9 }
 0x33e   : > { %p798_p8 = por %p797_p3, %p796_p13 }
 0x33f   : > { %p794_p5 = pneg %p793_p7 }
 0x341   : > { %p799_p10 = pnand %p798_p8, %p794_p5 }
 0x343   : > { %802 = shalt.err (!%p799_p10)
}
 0x344   : > { %602 = dma.vmem_to_hbm [thread:$0]  (%p1163_p9), %s1093_s11, 128, %s1091_s14, %s389_s7   ;;  %v383_v25 = vpop.f32.mrf.mxu1 }
 0x346   : > { %v593_v26 = vpop.f32.mrf.mxu1 }
 0x347 PF: > { %s432_s5 = sand.u32 1, %s841_s15   ;;  %p1164_p2 = scmp.ne.s32.totalorder %s1152_s28, 0 }
 0x348   : > { %p1165_p0 = scmp.ge.s32.totalorder %s853_s18, 2  ;;  %s433_s17 = scalar_lea.sflag [#allocation4], %s432_s5 }
 0x34a   : > { %p618_p4 = pnand %p1165_p0, %p1164_p2 }
 0x34c   : > { %p619_p11 = pneg %p618_p4 }
 0x34e   : > { %832 = dma.done.wait (%p619_p11), %s433_s17, 128  }
 0x34f   : > { %834 = vsyncadd (%p619_p11), %s433_s17, 4294967168  ;;  %s442_s24 = scalar_lea.sflag [#allocation10], %s432_s5 }
 0x350   : > { %836 = dma.done.wait (%p619_p11), %s442_s24, 128  }
 0x351   : > { %838 = vsyncadd (%p619_p11), %s442_s24, 4294967168  ;;  %s1166_s27 = sld [smem:[#allocation16_spill]]  ;;  %p24_p9 = scmp.ge.s32.totalorder %s914_s21, 4  }
 0x352   : > { %s1167_s17 = sld [smem:[#allocation17_spill]]  ;;  %s1168_s15 = smov %s845_s16 }
 0x353   : > { %s1170_s18 = smov %s914_s21  ;;  %26 = sbr.rel (!%p24_p9) target bundleno = 12 (0xc), region = 111 }
 0x357   : > { %s1169_s16 = smov %s1166_s27 }
 0x358   :  { %447 = vsyncpa [#allocation3], 1 }
 0x359   :  { %449 = vsyncpa [#allocation3 + $0x1], 1 }
 0x35a   :  { %450 = vsyncpa [#allocation6], 1 }
 0x35b   :  { %452 = vsyncpa [#allocation6 + $0x1], 1 }
 0x35c   :  { %453 = vsyncpa [#allocation4], 1 }
 0x35d   :  { %455 = vsyncpa [#allocation4 + $0x1], 1 }
 0x35e   :  { %456 = vsyncpa [#allocation10], 1 }
 0x35f   :  { %458 = vsyncpa [#allocation10 + $0x1], 1 }

</bundles_post_ra>
